<compile_context>
chip_gen: v6e
topology: v6e:2x2x1
jax: 0.10.0
libtpu: 0.0.40
codegen_flags: <defaults>
</compile_context>

<pallas_src>
import math

import jax
import jax.numpy as jnp
from jax import lax
from jax.experimental import pallas as pl
from jax.experimental.pallas import tpu as pltpu


_IMAGENET_MEAN = jnp.array([0.485, 0.456, 0.406], jnp.float32)
_IMAGENET_STD = jnp.array([0.229, 0.224, 0.225], jnp.float32)

_LANES = 1024  # 8 sublanes x 128 lanes


# ----------------------------------------------------------------------------
# Small helpers
# ----------------------------------------------------------------------------

def _round_up(x, m):
    return ((x + m - 1) // m) * m


def _hw_tile(n, max_tile):
    """Tile size + padded extent for a length-n axis (max_tile is a multiple of 128)."""
    if n <= max_tile:
        return n, n
    return max_tile, _round_up(n, max_tile)


def _apply_act(x, act):
    if act == "relu":
        return jnp.maximum(x, 0.0)
    if act == "sigmoid":
        return jax.nn.sigmoid(x)
    if act == "tanh":
        return jnp.tanh(x)
    if act == "hardswish":
        return x * jnp.clip(x + 3.0, 0.0, 6.0) * (1.0 / 6.0)
    return x


# ----------------------------------------------------------------------------
# Pallas kernels
# ----------------------------------------------------------------------------

def pallas_matmul_bias_act(a, w, b, act="none"):
    """act(a @ w + b).  a:[M,K], w:[K,N], b:[N].  bf16 MXU inputs, f32 accumulate."""
    M, K = a.shape
    Kw, N = w.shape
    assert K == Kw
    a16 = a.astype(jnp.bfloat16)
    w16 = w.astype(jnp.bfloat16)
    bf = b.astype(jnp.float32)

    # M tiling (pad the rare remainder).
    tm = min(512, _round_up(M, 8))
    Mp = _round_up(M, tm)
    if Mp != M:
        a16 = jnp.pad(a16, ((0, Mp - M), (0, 0)))

    # N tiling for wide outputs (keeps lane-dense 256-wide blocks, lowers VMEM pressure).
    if N > 512:
        tn = 256
        Np = _round_up(N, tn)
        if Np != N:
            w16 = jnp.pad(w16, ((0, 0), (0, Np - N)))
            bf = jnp.pad(bf, (0, Np - N))
    else:
        tn, Np = N, N
    b2 = bf.reshape(1, Np)

    def kernel(a_ref, w_ref, b_ref, o_ref):
        acc = jnp.dot(a_ref[...], w_ref[...], preferred_element_type=jnp.float32)
        o_ref[...] = _apply_act(acc + b_ref[...], act)

    out = pl.pallas_call(
        kernel,
        out_shape=jax.ShapeDtypeStruct((Mp, Np), jnp.float32),
        grid=(Mp // tm, Np // tn),
        in_specs=[
            pl.BlockSpec((tm, K), lambda i, j: (i, 0)),
            pl.BlockSpec((K, tn), lambda i, j: (0, j)),
            pl.BlockSpec((1, tn), lambda i, j: (0, j)),
        ],
        out_specs=pl.BlockSpec((tm, tn), lambda i, j: (i, j)),
        compiler_params=pltpu.CompilerParams(
            dimension_semantics=("parallel", "parallel"),
            vmem_limit_bytes=32 * 1024 * 1024),
    )(a16, w16, b2)
    if Mp != M or Np != N:
        out = out[:M, :N]
    return out


def pallas_elementwise(fn, *xs):
    """Elementwise fn over same-shaped arrays, tiled on lane-dense (rows, 1024) blocks."""
    shape = xs[0].shape
    n = math.prod(shape)
    rows = max(-(-n // _LANES), 1)
    tr, rowsp = _hw_tile(rows, 256)
    npad = rowsp * _LANES
    flats = []
    for x in xs:
        f = x.astype(jnp.float32).reshape(-1)
        if npad != n:
            f = jnp.pad(f, (0, npad - n))
        flats.append(f.reshape(rowsp, _LANES))

    def kernel(*refs):
        out_ref = refs[-1]
        out_ref[...] = fn(*[r[...] for r in refs[:-1]])

    out = pl.pallas_call(
        kernel,
        out_shape=jax.ShapeDtypeStruct((rowsp, _LANES), jnp.float32),
        grid=(rowsp // tr,),
        in_specs=[pl.BlockSpec((tr, _LANES), lambda i: (i, 0)) for _ in flats],
        out_specs=pl.BlockSpec((tr, _LANES), lambda i: (i, 0)),
        compiler_params=pltpu.CompilerParams(dimension_semantics=("parallel",)),
    )(*flats)
    return out.reshape(-1)[:n].reshape(shape)


def pallas_global_avg_pool(x):
    """x: [B,H,W,C] -> [B,C] spatial mean; spatially tiled with a VMEM accumulator."""
    B, H, W, C = x.shape
    HW = H * W
    xf = x.astype(jnp.float32).reshape(B, HW, C)
    t, HWp = _hw_tile(HW, 512)
    if HWp != HW:
        xf = jnp.pad(xf, ((0, 0), (0, HWp - HW), (0, 0)))   # zero pad: sum unaffected
    inv = 1.0 / float(HW)

    def kernel(x_ref, o_ref, acc_ref):
        @pl.when(pl.program_id(0) == 0)
        def _():
            acc_ref[...] = jnp.zeros_like(acc_ref)
        acc_ref[...] += jnp.sum(x_ref[...], axis=1)

        @pl.when(pl.program_id(0) == pl.num_programs(0) - 1)
        def _():
            o_ref[...] = acc_ref[...] * inv

    return pl.pallas_call(
        kernel,
        out_shape=jax.ShapeDtypeStruct((B, C), jnp.float32),
        grid=(HWp // t,),
        in_specs=[pl.BlockSpec((B, t, C), lambda i: (0, i, 0))],
        out_specs=pl.BlockSpec((B, C), lambda i: (0, 0)),
        scratch_shapes=[pltpu.VMEM((B, C), jnp.float32)],
        compiler_params=pltpu.CompilerParams(dimension_semantics=("arbitrary",)),
    )(xf)


def pallas_channel_gate(f, g, residual=False):
    """f: [B,H,W,C], g: [B,C]. Returns f * g (+ f if residual); gate broadcast in-kernel."""
    B, H, W, C = f.shape
    HW = H * W
    ff = f.astype(jnp.float32).reshape(B, HW, C)
    gf = g.astype(jnp.float32)
    t, HWp = _hw_tile(HW, 512)
    if HWp != HW:
        ff = jnp.pad(ff, ((0, 0), (0, HWp - HW), (0, 0)))

    def kernel(f_ref, g_ref, o_ref):
        fv = f_ref[...]
        gv = g_ref[...][:, None, :]
        out = fv * gv
        if residual:
            out = out + fv
        o_ref[...] = out

    out = pl.pallas_call(
        kernel,
        out_shape=jax.ShapeDtypeStruct((B, HWp, C), jnp.float32),
        grid=(HWp // t,),
        in_specs=[pl.BlockSpec((B, t, C), lambda i: (0, i, 0)),
                  pl.BlockSpec((B, C), lambda i: (0, 0))],
        out_specs=pl.BlockSpec((B, t, C), lambda i: (0, i, 0)),
        compiler_params=pltpu.CompilerParams(dimension_semantics=("parallel",)),
    )(ff, gf)
    return out[:, :HW].reshape(B, H, W, C)


def pallas_normalize(x):
    """ImageNet (x - mean)/std on a lane-dense (B*H, W*3) view; constants stay tiny."""
    B, H, W, C = x.shape
    rows, cols = B * H, W * C
    xf = x.astype(jnp.float32).reshape(rows, cols)
    mean_row = jnp.tile(_IMAGENET_MEAN, W).reshape(1, cols)
    inv_std_row = jnp.tile(1.0 / _IMAGENET_STD, W).reshape(1, cols)
    tr, rowsp = _hw_tile(rows, 128)
    if rowsp != rows:
        xf = jnp.pad(xf, ((0, rowsp - rows), (0, 0)))

    def kernel(x_ref, m_ref, s_ref, o_ref):
        o_ref[...] = (x_ref[...] - m_ref[...]) * s_ref[...]

    out = pl.pallas_call(
        kernel,
        out_shape=jax.ShapeDtypeStruct((rowsp, cols), jnp.float32),
        grid=(rowsp // tr,),
        in_specs=[pl.BlockSpec((tr, cols), lambda i: (i, 0)),
                  pl.BlockSpec((1, cols), lambda i: (0, 0)),
                  pl.BlockSpec((1, cols), lambda i: (0, 0))],
        out_specs=pl.BlockSpec((tr, cols), lambda i: (i, 0)),
        compiler_params=pltpu.CompilerParams(dimension_semantics=("parallel",)),
    )(xf, mean_row, inv_std_row)
    return out[:rows].reshape(B, H, W, C)


def pallas_project_residual_clamp(hid, src, w, b):
    """Fused 1x1 projection (16->4) + fgr residual add + clamp, lane-dense channel-row output.

    hid: [B,H,W,16] NHWC, src: [B,H,W,3] NHWC, w: [1,1,16,4], b: [4].
    Returns [B, 4, H*W] f32 (channels first -> reshapes straight to NCHW)."""
    B, H, W, Ch = hid.shape
    HW = H * W
    hf = hid.astype(jnp.float32).reshape(B, HW, Ch)
    sf = src.astype(jnp.float32).reshape(B, HW, 3)
    wt = jnp.transpose(w.reshape(Ch, 4)).astype(jnp.float32)            # (4, Ch)
    bt = b.astype(jnp.float32).reshape(4, 1)
    # Selector adds src to the 3 fgr channels only (alpha row gets 0).
    pt = jnp.concatenate([jnp.eye(3, dtype=jnp.float32),
                          jnp.zeros((1, 3), jnp.float32)], axis=0)       # (4, 3)

    t, HWp = _hw_tile(HW, 512)
    if HWp != HW:
        hf = jnp.pad(hf, ((0, 0), (0, HWp - HW), (0, 0)))
        sf = jnp.pad(sf, ((0, 0), (0, HWp - HW), (0, 0)))

    dn = (((1,), (1,)), ((), ()))   # contract last dims: (4,K) x (t,K)^T -> (4,t)

    def kernel(h_ref, s_ref, w_ref, p_ref, b_ref, o_ref):
        h = h_ref[0]                                                     # (t, 16)
        s = s_ref[0]                                                     # (t, 3)
        acc = lax.dot_general(w_ref[...], h, dn,
                              preferred_element_type=jnp.float32)        # (4, t)
        acc = acc + lax.dot_general(p_ref[...], s, dn,
                                    preferred_element_type=jnp.float32)  # + src residual
        acc = acc + b_ref[...]
        o_ref[0] = jnp.clip(acc, 0.0, 1.0)

    out = pl.pallas_call(
        kernel,
        out_shape=jax.ShapeDtypeStruct((B, 4, HWp), jnp.float32),
        grid=(B, HWp // t),
        in_specs=[pl.BlockSpec((1, t, Ch), lambda bi, ti: (bi, ti, 0)),
                  pl.BlockSpec((1, t, 3), lambda bi, ti: (bi, ti, 0)),
                  pl.BlockSpec((4, Ch), lambda bi, ti: (0, 0)),
                  pl.BlockSpec((4, 3), lambda bi, ti: (0, 0)),
                  pl.BlockSpec((4, 1), lambda bi, ti: (0, 0))],
        out_specs=pl.BlockSpec((1, 4, t), lambda bi, ti: (bi, 0, ti)),
        compiler_params=pltpu.CompilerParams(
            dimension_semantics=("parallel", "parallel")),
    )(hf, sf, wt, pt, bt)
    return out[:, :, :HW]


# ----------------------------------------------------------------------------
# Conv / pooling / upsampling building blocks (im2col glue + Pallas matmul)
# ----------------------------------------------------------------------------

def _im2col(x, kh, kw, stride, padding):
    # x: [B, H, W, C]  ->  patches [B*Ho*Wo, kh*kw*C], (B, Ho, Wo)
    B, H, W, C = x.shape
    if padding > 0:
        x = jnp.pad(x, ((0, 0), (padding, padding), (padding, padding), (0, 0)))
    Ho = (H + 2 * padding - kh) // stride + 1
    Wo = (W + 2 * padding - kw) // stride + 1
    if kh == 1 and kw == 1 and stride == 1:
        return x.reshape(B * Ho * Wo, C), (B, Ho, Wo)
    cols = []
    for i in range(kh):
        for j in range(kw):
            cols.append(x[:, i:i + stride * Ho:stride, j:j + stride * Wo:stride, :])
    patches = jnp.concatenate(cols, axis=-1)          # [B, Ho, Wo, kh*kw*C]
    return patches.reshape(B * Ho * Wo, kh * kw * C), (B, Ho, Wo)


def conv2d(x, w, b, stride=1, padding=0, act="none"):
    """x: [B,H,W,Cin] NHWC, w: [kh,kw,Cin,Cout], b: [Cout]."""
    kh, kw, cin, cout = w.shape
    cols, (B, Ho, Wo) = _im2col(x, kh, kw, stride, padding)
    out = pallas_matmul_bias_act(cols, w.reshape(kh * kw * cin, cout), b, act)
    return out.reshape(B, Ho, Wo, cout)


def avgpool2x2(x):
    # TODO(synk): still 4 strided XLA slices; only applied to the 3-channel src pyramid.
    a = x[:, 0::2, 0::2, :]
    b = x[:, 0::2, 1::2, :]
    c = x[:, 1::2, 0::2, :]
    d = x[:, 1::2, 1::2, :]
    return pallas_elementwise(lambda p, q, r, s: 0.25 * (p + q + r + s), a, b, c, d)


def upsample2x_bilinear(x):
    B, H, W, C = x.shape
    # align_corners=False semantics (half-pixel centers), matches nn.Upsample in RVM.
    return jax.image.resize(x, (B, 2 * H, 2 * W, C), method="bilinear")


# ----------------------------------------------------------------------------
# Parameter construction (deterministic, synthetic)
# ----------------------------------------------------------------------------

class ParamGen:
    def __init__(self, key):
        self.key = key

    def take(self, shape, scale=0.1):
        self.key, sub = jax.random.split(self.key)
        return jax.random.normal(sub, shape, jnp.float32) * scale


def conv_params(pg, kh, kw, cin, cout):
    return {"w": pg.take((kh, kw, cin, cout)), "b": pg.take((cout,))}


def gru_params(pg, c):
    # ConvGRU(channels=c): ih conv (2c -> 2c, 3x3, sigmoid), hh conv (2c -> c, 3x3, tanh)
    return {"ih": conv_params(pg, 3, 3, 2 * c, 2 * c),
            "hh": conv_params(pg, 3, 3, 2 * c, c)}


def make_backbone_params(pg):
    # TODO(synk): simplified MobileNetV3-Large (one strided conv per stage).
    return {
        "stem": conv_params(pg, 3, 3, 3, 16),    # /2  -> f1 (16)
        "s2":   conv_params(pg, 3, 3, 16, 24),   # /4  -> f2 (24)
        "s3":   conv_params(pg, 3, 3, 24, 40),   # /8  -> f3 (40)
        "s4":   conv_params(pg, 3, 3, 40, 960),  # /16 -> f4 (960)
    }


def make_lraspp_params(pg, cin, cout):
    return {
        "aspp1": conv_params(pg, 1, 1, cin, cout),           # conv1x1 + (BN) + ReLU
        "aspp2_w": pg.take((cin, cout)),                      # GAP -> conv1x1 -> sigmoid
        "aspp2_b": pg.take((cout,)),
    }


def make_gam_params(pg, channels):
    levels = []
    for c in channels:
        r = max(c // 4, 1)
        levels.append({
            "w1": pg.take((c, r)), "b1": pg.take((r,)),
            "w2": pg.take((r, c)), "b2": pg.take((c,)),
        })
    return levels


def make_decoder_params(pg):
    # RecurrentDecoder([16, 24, 40, 128], [80, 40, 32, 16])
    return {
        "decode4": {"gru": gru_params(pg, 64)},                               # BottleneckBlock(128)
        "decode3": {"conv": conv_params(pg, 3, 3, 128 + 40 + 3, 80), "gru": gru_params(pg, 40)},
        "decode2": {"conv": conv_params(pg, 3, 3, 80 + 24 + 3, 40),  "gru": gru_params(pg, 20)},
        "decode1": {"conv": conv_params(pg, 3, 3, 40 + 16 + 3, 32),  "gru": gru_params(pg, 16)},
        "decode0": {"conv1": conv_params(pg, 3, 3, 32 + 3, 16),
                    "conv2": conv_params(pg, 3, 3, 16, 16)},
    }


def make_params(key):
    pg = ParamGen(key)
    return {
        "backbone": make_backbone_params(pg),
        "aspp": make_lraspp_params(pg, 960, 128),
        "encoder_t": {
            "backbone": make_backbone_params(pg),
            "aspp": make_lraspp_params(pg, 960, 128),
        },
        "attn": make_gam_params(pg, [16, 24, 40, 128]),
        "decoder": make_decoder_params(pg),
        "project_mat": conv_params(pg, 1, 1, 16, 4),
        "project_seg": conv_params(pg, 1, 1, 16, 1),   # unused when segmentation_pass=False
    }


# ----------------------------------------------------------------------------
# Sub-module forwards
# ----------------------------------------------------------------------------

def backbone_forward(p, x):
    x = pallas_normalize(x)
    f1 = conv2d(x,  p["stem"]["w"], p["stem"]["b"], stride=2, padding=1, act="hardswish")
    f2 = conv2d(f1, p["s2"]["w"],   p["s2"]["b"],   stride=2, padding=1, act="relu")
    f3 = conv2d(f2, p["s3"]["w"],   p["s3"]["b"],   stride=2, padding=1, act="relu")
    f4 = conv2d(f3, p["s4"]["w"],   p["s4"]["b"],   stride=2, padding=1, act="hardswish")
    return f1, f2, f3, f4


def lraspp_forward(p, x):
    a1 = conv2d(x, p["aspp1"]["w"], p["aspp1"]["b"], stride=1, padding=0, act="relu")
    g = pallas_global_avg_pool(x)                                               # [B, Cin]
    g = pallas_matmul_bias_act(g, p["aspp2_w"], p["aspp2_b"], act="sigmoid")    # [B, Cout]
    return pallas_channel_gate(a1, g, residual=False)


def gam_level_forward(p, f, f_t):
    # TODO(synk): exact GAM internals unavailable; channel attention from target features.
    g = pallas_global_avg_pool(f_t)                                   # [B, C]
    g = pallas_matmul_bias_act(g, p["w1"], p["b1"], act="relu")
    g = pallas_matmul_bias_act(g, p["w2"], p["b2"], act="sigmoid")    # [B, C]
    return pallas_channel_gate(f, g, residual=True)                   # f*g + f


def conv_gru(p, x, h):
    """RVM ConvGRU: r,z = sigmoid(conv([x,h])); c = tanh(conv([x, r*h])); h' = (1-z)h + zc."""
    c = x.shape[-1]
    xh = jnp.concatenate([x, h], axis=-1)
    rz = conv2d(xh, p["ih"]["w"], p["ih"]["b"], stride=1, padding=1, act="sigmoid")
    r, z = rz[..., :c], rz[..., c:]
    rh = pallas_elementwise(lambda a, b: a * b, r, h)
    xrh = jnp.concatenate([x, rh], axis=-1)
    cand = conv2d(xrh, p["hh"]["w"], p["hh"]["b"], stride=1, padding=1, act="tanh")
    h_new = pallas_elementwise(lambda hh, zz, cc: (1.0 - zz) * hh + zz * cc, h, z, cand)
    return h_new


def bottleneck_block(p, x, r):
    c = x.shape[-1]
    a, b = x[..., : c // 2], x[..., c // 2:]
    if r is None:
        r = jnp.zeros_like(b)
    b = conv_gru(p["gru"], b, r)
    return jnp.concatenate([a, b], axis=-1), b


def upsampling_block(p, out_ch, x, f, s, r):
    x = upsample2x_bilinear(x)
    x = x[:, : s.shape[1], : s.shape[2], :]
    x = jnp.concatenate([x, f, s], axis=-1)
    x = conv2d(x, p["conv"]["w"], p["conv"]["b"], stride=1, padding=1, act="relu")
    a, b = x[..., : out_ch // 2], x[..., out_ch // 2:]
    if r is None:
        r = jnp.zeros_like(b)
    b = conv_gru(p["gru"], b, r)
    return jnp.concatenate([a, b], axis=-1), b


def output_block(p, x, s):
    x = upsample2x_bilinear(x)
    x = x[:, : s.shape[1], : s.shape[2], :]
    x = jnp.concatenate([x, s], axis=-1)
    x = conv2d(x, p["conv1"]["w"], p["conv1"]["b"], stride=1, padding=1, act="relu")
    x = conv2d(x, p["conv2"]["w"], p["conv2"]["b"], stride=1, padding=1, act="relu")
    return x


def decoder_forward(p, s0, f1, f2, f3, f4, r1, r2, r3, r4):
    s1 = avgpool2x2(s0)
    s2 = avgpool2x2(s1)
    s3 = avgpool2x2(s2)
    x4, r4 = bottleneck_block(p["decode4"], f4, r4)
    x3, r3 = upsampling_block(p["decode3"], 80, x4, f3, s3, r3)
    x2, r2 = upsampling_block(p["decode2"], 40, x3, f2, s2, r2)
    x1, r1 = upsampling_block(p["decode1"], 32, x2, f1, s1, r1)
    x0 = output_block(p["decode0"], x1, s0)
    return x0, r1, r2, r3, r4


# ----------------------------------------------------------------------------
# Full model forward  (downsample_ratio=1, segmentation_pass=False)
# ----------------------------------------------------------------------------

def matting_network2_forward(params, src_nchw, tgt_nchw):
    """src/tgt: [B, 3, H, W] float32 in [0, 1].  Returns [fgr, pha, r1, r2, r3, r4] in NCHW."""
    src = jnp.transpose(src_nchw, (0, 2, 3, 1))   # NHWC for kernel compute
    tgt = jnp.transpose(tgt_nchw, (0, 2, 3, 1))
    B, H, W, _ = src.shape

    # backbone + LR-ASPP on source
    f1, f2, f3, f4 = backbone_forward(params["backbone"], src)
    f4 = lraspp_forward(params["aspp"], f4)

    # encoder_t on target image (independent backbone + LR-ASPP)
    t1, t2, t3, t4 = backbone_forward(params["encoder_t"]["backbone"], tgt)
    t4 = lraspp_forward(params["encoder_t"]["aspp"], t4)

    # GAM fusion per scale
    f1m = gam_level_forward(params["attn"][0], f1, t1)
    f2m = gam_level_forward(params["attn"][1], f2, t2)
    f3m = gam_level_forward(params["attn"][2], f3, t3)
    f4m = gam_level_forward(params["attn"][3], f4, t4)

    # recurrent decoder (r1..r4 = None -> zero states)
    hid, r1, r2, r3, r4 = decoder_forward(params["decoder"], src,
                                          f1m, f2m, f3m, f4m,
                                          None, None, None, None)

    # fused projection -> fgr residual + src, alpha; clamp to [0,1]; lane-dense channel rows
    proj = pallas_project_residual_clamp(hid, src,
                                         params["project_mat"]["w"],
                                         params["project_mat"]["b"])   # [B, 4, H*W]
    out = proj.reshape(B, 4, H, W)                                      # already NCHW-ordered
    fgr = out[:, :3]
    pha = out[:, 3:4]
    recs = [jnp.transpose(r, (0, 3, 1, 2)) for r in (r1, r2, r3, r4)]
    return [fgr, pha, *recs]


# ----------------------------------------------------------------------------
# Main
# ----------------------------------------------------------------------------

if __name__ == "__main__":
    key = jax.random.PRNGKey(0)
    k_params, k_src, k_tgt = jax.random.split(key, 3)

    params = make_params(k_params)

    B, H, W = 2, 32, 32
    src = jax.random.uniform(k_src, (B, 3, H, W), jnp.float32)
    target_img = jax.random.uniform(k_tgt, (B, 3, H, W), jnp.float32)

    outputs = matting_network2_forward(params, src, target_img)
    outputs = jax.block_until_ready(outputs)

    fgr, pha, r1, r2, r3, r4 = outputs
    assert fgr.shape == (B, 3, H, W)
    assert pha.shape == (B, 1, H, W)
    assert r1.shape == (B, 16, H // 2, W // 2)
    assert r2.shape == (B, 20, H // 4, W // 4)
    assert r3.shape == (B, 40, H // 8, W // 8)
    assert r4.shape == (B, 64, H // 16, W // 16)
    assert float(jnp.min(fgr)) >= 0.0 and float(jnp.max(fgr)) <= 1.0
    assert float(jnp.min(pha)) >= 0.0 and float(jnp.max(pha)) <= 1.0

    print("KERNEL_OK")
</pallas_src>

<mosaic_0001>
module attributes {stable_mosaic.version = 11 : i64} {
  func.func @kernel(%arg0: i32, %arg1: memref<64x96xf32, #tpu.memory_space<vmem>>, %arg2: memref<1x96xf32, #tpu.memory_space<vmem>>, %arg3: memref<1x96xf32, #tpu.memory_space<vmem>>, %arg4: memref<64x96xf32, #tpu.memory_space<vmem>>) attributes {dimension_semantics = [#tpu.dimension_semantics<parallel>], iteration_bounds = array<i64: 1>, scalar_prefetch = 0 : i64, scratch_operands = 0 : i64, tpu.core_type = #tpu.core_type<tc>, window_params = [{transform_indices = @transform_0, window_bounds = array<i64: 64, 96>}, {pipeline_mode = #tpu.pipeline_mode<synchronous>, transform_indices = @transform_1, window_bounds = array<i64: 1, 96>}, {pipeline_mode = #tpu.pipeline_mode<synchronous>, transform_indices = @transform_2, window_bounds = array<i64: 1, 96>}, {transform_indices = @transform_3, window_bounds = array<i64: 64, 96>}]} {
    %c0 = arith.constant 0 : index
    %c0_0 = arith.constant 0 : index
    %0 = vector.load %arg1[%c0, %c0_0] : memref<64x96xf32, #tpu.memory_space<vmem>>, vector<64x96xf32>
    %c0_1 = arith.constant 0 : index
    %c0_2 = arith.constant 0 : index
    %1 = vector.load %arg2[%c0_1, %c0_2] : memref<1x96xf32, #tpu.memory_space<vmem>>, vector<1x96xf32>
    %2 = vector.broadcast %1 : vector<1x96xf32> to vector<64x96xf32>
    %3 = arith.subf %0, %2 : vector<64x96xf32>
    %c0_3 = arith.constant 0 : index
    %c0_4 = arith.constant 0 : index
    %4 = vector.load %arg3[%c0_3, %c0_4] : memref<1x96xf32, #tpu.memory_space<vmem>>, vector<1x96xf32>
    %5 = vector.broadcast %4 : vector<1x96xf32> to vector<64x96xf32>
    %6 = arith.mulf %3, %5 : vector<64x96xf32>
    %c0_5 = arith.constant 0 : index
    %c0_6 = arith.constant 0 : index
    %7 = vector.load %arg4[%c0_5, %c0_6] : memref<64x96xf32, #tpu.memory_space<vmem>>, vector<64x96xf32>
    tpu.vector_store %arg4[%c0_5, %c0_6], %6 {strides = array<i32>} : memref<64x96xf32, #tpu.memory_space<vmem>>, vector<64x96xf32>,
    return
  }
  func.func @transform_0(%arg0: i32) -> (i32, i32) {
    %c0_i32 = arith.constant 0 : i32
    %c0_i32_0 = arith.constant 0 : i32
    return %arg0, %c0_i32 : i32, i32
  }
  func.func @transform_1(%arg0: i32) -> (i32, i32) {
    %c0_i32 = arith.constant 0 : i32
    %c0_i32_0 = arith.constant 0 : i32
    %c0_i32_1 = arith.constant 0 : i32
    return %c0_i32, %c0_i32_0 : i32, i32
  }
  func.func @transform_2(%arg0: i32) -> (i32, i32) {
    %c0_i32 = arith.constant 0 : i32
    %c0_i32_0 = arith.constant 0 : i32
    %c0_i32_1 = arith.constant 0 : i32
    return %c0_i32, %c0_i32_0 : i32, i32
  }
  func.func @transform_3(%arg0: i32) -> (i32, i32) {
    %c0_i32 = arith.constant 0 : i32
    %c0_i32_0 = arith.constant 0 : i32
    return %arg0, %c0_i32 : i32, i32
  }
}

</mosaic_0001>

<bundles_post_ra>
// kernel: tpu_custom_call.1
= control target key start
LH: loop header
LB: loop body
LE: loop exit
PB: predicated region body
PF: predicated region fallthrough
CT: control target
= control target key end

     0   :  { %8 = vsyncpa [#allocation3], 0  ;;  %s193_s0 = inlined_call_operand.hbm [shape: f32[64,96], index: 0, kind: input, shape index: {}]   ;;  %s194_s1 = inlined_call_operand.vmem [shape: f32[1,96], index: 1, kind: input, shape index: {}]   ;;  %s195_s2 = inlined_call_operand.vmem [shape: f32[1,96], index: 2, kind: input, shape index: {}]   ;;  %s196_s3 = inlined_call_operand.hbm [shape: f32[64,96], index: 3, kind: output, shape index: {}]  }
   0x1   :  { %9 = vsyncpa [#allocation4], 0  ;;  %s143_s12 = smov [#allocation2]  }
   0x2   :  { %s15_s13 = sshll.u32 %s143_s12, 4  ;;  %s16_s13 = int_to_ptr.vmem [resolvable:$true] %s15_s13 }
   0x3   :  { %s107_s14 = scalar_lea.vmem %s16_s13, 1024  ;;  %p112_p1 = scmp.lt.s32.totalorder %s16_s13, %s16_s13 }
   0x4   :  { %p108_p0 = scmp.ne.s32.totalorder %s16_s13, %s107_s14  ;;  %p113_p2 = scmp.lt.s32.totalorder %s107_s14, %s107_s14 }
   0x6   :  { %p114_p3 = por %p113_p2, %p112_p1 }
   0x8   :  { %p115_p4 = pnand %p114_p3, %p108_p0 }
   0xa   :  { %118 = shalt.err (!%p115_p4)
}
   0xb   :  { %s144_s15 = smov 128   ;;  %s145_s16 = smov 8  }
   0xc   :  { %21 = dma.hbm_to_vmem [thread:$0]  %s193_s0, 1024, %s16_s13, [#allocation3], %s144_s15, %s144_s15, %s145_s16  }
   0xd   :  { %139 = dma.done.wait [#allocation3], 1024  }
   0xe   :  { %140 = vsyncadd [#allocation3], 4294966272  ;;  %v29_v0 = vld [vmem:[#allocation2] sm:$0xff]  ;;  %v30_v4 = vld [vmem:[#allocation2 + $0x8] sm:$0xff]  ;;  %vm67_vm0 = vcmask 785408   ;;  %s146_s0 = smov [#allocation5]  }
   0xf   :  { %v93_v1 = vld [vmem:[%s194_s1] ss:$0 sm:$0xff]  ;;  %v31_v5 = vld [vmem:[#allocation2 + $0x10] sm:$0xff]  ;;  %v32_v6 = vld [vmem:[#allocation2 + $0x18] sm:$0xff]  ;;  %s81_s1 = sshll.u32 %s146_s0, 4  ;;  %s82_s1 = int_to_ptr.vmem [resolvable:$true] %s81_s1 }
  0x10   :  { %v94_v2 = vld [vmem:[%s195_s2] ss:$0 sm:$0xff]  ;;  %v44_v3 = vsub.f32 %v29_v0, %v93_v1  ;;  %v45_v7 = vsub.f32 %v30_v4, %v93_v1  ;;  %v46_v8 = vsub.f32 %v31_v5, %v93_v1  ;;  %v47_v9 = vsub.f32 %v32_v6, %v93_v1  ;;  %v34_v11 = vld [vmem:[#allocation2 + $0x28] sm:$0xff]  ;;  %v35_v12 = vld [vmem:[#allocation2 + $0x30] sm:$0xff]  ;;  %s119_s2 = scalar_lea.vmem %s82_s1, 1024  ;;  %p124_p6 = scmp.lt.s32.totalorder %s82_s1, %s82_s1 }
  0x11   :  { %v33_v10 = vld [vmem:[#allocation2 + $0x20] sm:$0xff]  ;;  %v49_v15 = vsub.f32 %v34_v11, %v93_v1  ;;  %v50_v16 = vsub.f32 %v35_v12, %v93_v1  ;;  %v36_v17 = vld [vmem:[#allocation2 + $0x38] sm:$0xff]  ;;  %p120_p5 = scmp.ne.s32.totalorder %s82_s1, %s119_s2  ;;  %p125_p7 = scmp.lt.s32.totalorder %s119_s2, %s119_s2 }
  0x12   :  { %v59_v13 = vmul.f32 %v94_v2, %v44_v3  ;;  %v48_v14 = vsub.f32 %v33_v10, %v93_v1  ;;  %v60_v18 = vmul.f32 %v94_v2, %v45_v7  ;;  %v61_v19 = vmul.f32 %v94_v2, %v46_v8 }
  0x13   :  { %v62_v20 = vmul.f32 %v94_v2, %v47_v9  ;;  %v51_v21 = vsub.f32 %v36_v17, %v93_v1  ;;  %v64_v23 = vmul.f32 %v94_v2, %v49_v15  ;;  %v65_v24 = vmul.f32 %v94_v2, %v50_v16  ;;  %p126_p8 = por %p125_p7, %p124_p6 }
  0x14   :  { %68 = vst.msk [vmem:[#allocation5] sm:$0xff] %vm67_vm0, %v59_v13  ;;  %v63_v22 = vmul.f32 %v94_v2, %v48_v14  ;;  %69 = vst.msk [vmem:[#allocation5 + $0x8] sm:$0xff] %vm67_vm0, %v60_v18 }
  0x15   :  { %70 = vst.msk [vmem:[#allocation5 + $0x10] sm:$0xff] %vm67_vm0, %v61_v19  ;;  %71 = vst.msk [vmem:[#allocation5 + $0x18] sm:$0xff] %vm67_vm0, %v62_v20  ;;  %v66_v25 = vmul.f32 %v94_v2, %v51_v21  ;;  %p127_p9 = pnand %p126_p8, %p120_p5 }
  0x16   :  { %72 = vst.msk [vmem:[#allocation5 + $0x20] sm:$0xff] %vm67_vm0, %v63_v22  ;;  %73 = vst.msk [vmem:[#allocation5 + $0x28] sm:$0xff] %vm67_vm0, %v64_v23 }
  0x17   :  { %74 = vst.msk [vmem:[#allocation5 + $0x30] sm:$0xff] %vm67_vm0, %v65_v24  ;;  %75 = vst.msk [vmem:[#allocation5 + $0x38] sm:$0xff] %vm67_vm0, %v66_v25 }
  0x18   :  { %130 = shalt.err (!%p127_p9)
}
  0x19   :  { %87 = dma.vmem_to_hbm [thread:$0]  %s82_s1, 1024, %s196_s3, [#allocation4], %s144_s15, %s144_s15, %s145_s16  }
  0x1a   :  { %141 = dma.done.wait [#allocation4], 1024  }
  0x1b   :  { %142 = vsyncadd [#allocation4], 4294966272 }
  0x1c   :  { %91 = vsyncpa [#allocation3], 1 }
  0x1d   :  { %92 = vsyncpa [#allocation4], 1 }

</bundles_post_ra>
